<compile_context>
chip_gen: v7x
topology: tpu7x:2x2x1
jax: 0.10.0
libtpu: 0.0.40
codegen_flags: <defaults>
</compile_context>

<pallas_src>
import numpy as np

import jax
import jax.numpy as jnp
from jax.experimental import pallas as pl
from jax.experimental.pallas import tpu as pltpu

P_DROP = 0.1
BN_EPS = 1e-5
# Plain Python int: module-level jnp arrays closed over by the kernel become
# "captured constants" and pallas_call rejects them (previous failure).
KEEP_THRESHOLD = min(int((1.0 - P_DROP) * (2 ** 32)), 2 ** 32 - 1)

# Hash constants as numpy scalars (inlined as literals, never constvars).
_M1 = np.uint32(0x7FEB352D)
_M2 = np.uint32(0x846CA68B)
_PHI = np.uint32(0x9E3779B9)
_C1 = np.uint32(0x85EBCA6B)
_C2 = np.uint32(0xC2B2AE35)


def _finalize_u32(v):
    """Murmur-style 32-bit finalizer (vectorized integer VPU ops)."""
    v = v ^ (v >> np.uint32(16))
    v = v * _M1
    v = v ^ (v >> np.uint32(15))
    v = v * _M2
    v = v ^ (v >> np.uint32(16))
    return v


def _dropout_keep_mask(shape, col0_u32, seed_u32):
    """Keep mask (True = keep) of `shape` = (rows, cols).

    Full finalizers run on (1, cols) and (rows, 1) vectors (half / ~zero vreg
    cost vs the sublane-padded (rows, cols) tile); only ~5 integer ops run at
    full (rows, cols) size.
    """
    rows, cols = shape
    col = jax.lax.broadcasted_iota(jnp.int32, (1, cols), 1).astype(jnp.uint32)
    row = jax.lax.broadcasted_iota(jnp.int32, (rows, 1), 0).astype(jnp.uint32)
    col = col + col0_u32
    col_h = _finalize_u32((col * _PHI) ^ (seed_u32 * _C1))     # (1, cols)
    row_h = _finalize_u32((row * _C2) ^ (seed_u32 ^ _PHI))     # (rows, 1)
    v = col_h ^ row_h                                          # (rows, cols)
    v = v * _PHI
    v = v ^ (v >> np.uint32(15))
    return v < np.uint32(KEEP_THRESHOLD)


def _affine_vpu(w, b, x):
    """y = W @ x + b via unrolled broadcast FMAs on the VPU.

    w: (out, in), b: (out, 1), x: (in, T) -> (out, T).  K is 5 or 10, so this
    uses otherwise-idle VALU slots instead of a >95%-padded MXU tile.
    """
    acc = b                                            # (out, 1) -> broadcasts
    for k in range(w.shape[1]):
        acc = acc + w[:, k:k + 1] * x[k:k + 1, :]      # (out,1)*(1,T) -> (out,T)
    return acc


def net_kernel(seed_ref,                               # scalar prefetch (SMEM)
               x_ref, w1_ref, b1_ref, w2_ref, b2_ref,
               o_ref):
    x = x_ref[...]                                     # (5, T) f32, batch on lanes

    # fc1 (BatchNorm scale/shift already folded into w1/b1 by the wrapper).
    h = _affine_vpu(w1_ref[...], b1_ref[...], x)       # (10, T)

    # Dropout(p=0.1), training mode; 1/(1-p) rescale folded into w2.
    t = h.shape[1]
    col0 = (pl.program_id(0) * t).astype(jnp.uint32)   # global batch offset
    seed = seed_ref[0].astype(jnp.uint32)
    keep = _dropout_keep_mask(h.shape, col0, seed)
    h = jnp.where(keep, h, 0.0)

    # fc2 on the VPU.
    out = _affine_vpu(w2_ref[...], b2_ref[...], h)     # (3, T)
    o_ref[...] = out.astype(o_ref.dtype)


def net_forward(x, gamma, beta, w1, b1, w2, b2, seed, *, batch_tile=32768):
    """x: (N, 5) float32.  PyTorch param shapes: w1 (10,5), b1 (10,), w2 (3,10), b2 (3,)."""
    x = x.astype(jnp.float32)
    n, f = x.shape
    assert f == 5

    # -- BatchNorm1d training-mode batch statistics, folded into fc1 (affine
    #    composed with affine), so the kernel needs no extra BN inputs/ops. --
    mean = jnp.mean(x, axis=0)
    var = jnp.mean(jnp.square(x - mean), axis=0)           # biased (train mode)
    scale = gamma.astype(jnp.float32) * jax.lax.rsqrt(var + BN_EPS)   # (5,)
    shift = beta.astype(jnp.float32) - mean * scale                   # (5,)
    w1_f32 = w1.astype(jnp.float32)
    w1f = w1_f32 * scale[None, :]                                     # (10, 5)
    b1f = (b1.astype(jnp.float32) + w1_f32 @ shift).reshape(10, 1)    # (10, 1)
    # Dropout 1/(1-p) rescale folded into fc2 weights.
    w2f = w2.astype(jnp.float32) * np.float32(1.0 / (1.0 - P_DROP))   # (3, 10)
    b2f = b2.reshape(3, 1).astype(jnp.float32)

    # -- Batch tiling: large lane-dense tiles amortize the ~0.35 us/step cost.
    #    tile_n=32768 keeps per-step VMEM (~10-16 MiB with double buffering)
    #    under the 32 MiB limit requested below (valid on v5e/v6e/v7x). --
    n128 = max(pl.cdiv(n, 128) * 128, 128)
    tile_n = pl.cdiv(min(int(batch_tile), n128), 128) * 128
    grid_n = pl.cdiv(n128, tile_n)
    if grid_n == 1 and n128 >= 512:
        # Keep >= 2 grid steps so v7x's two TensorCores both get work.
        tile_n = pl.cdiv(pl.cdiv(n128, 2), 128) * 128
        grid_n = pl.cdiv(n128, tile_n)
    n_pad = tile_n * grid_n

    # (F, N) layout with the batch on the 128-wide lane axis.
    x_t = jnp.pad(x.T, ((0, 0), (0, n_pad - n)))            # (5, n_pad)

    seed_arr = jnp.asarray([seed], dtype=jnp.int32)

    grid_spec = pltpu.PrefetchScalarGridSpec(
        num_scalar_prefetch=1,
        grid=(grid_n,),
        in_specs=[
            pl.BlockSpec((5, tile_n), lambda i, s: (0, i)),   # x (streamed)
            pl.BlockSpec((10, 5), lambda i, s: (0, 0)),       # W1 (BN folded)
            pl.BlockSpec((10, 1), lambda i, s: (0, 0)),       # b1 (BN folded)
            pl.BlockSpec((3, 10), lambda i, s: (0, 0)),       # W2 (drop scale folded)
            pl.BlockSpec((3, 1), lambda i, s: (0, 0)),        # b2
        ],
        out_specs=pl.BlockSpec((3, tile_n), lambda i, s: (0, i)),
    )

    out_t = pl.pallas_call(
        net_kernel,
        out_shape=jax.ShapeDtypeStruct((3, n_pad), jnp.float32),
        grid_spec=grid_spec,
        compiler_params=pltpu.CompilerParams(
            dimension_semantics=("parallel",),                # v7x: 2 TCs share batch
            vmem_limit_bytes=32 * 1024 * 1024,                # > v5e's 16 MiB default
        ),
    )(seed_arr, x_t, w1f, b1f, w2f, b2f)

    return out_t[:, :n].T                                     # back to (N, 3)


def init_params(key):
    k1, k2 = jax.random.split(key, 2)
    # _initialize_weights(): BN weight=1, bias=0; Linear weight ~ N(0, 0.01), bias=0
    gamma = jnp.ones((5,), jnp.float32)
    beta = jnp.zeros((5,), jnp.float32)
    w1 = 0.01 * jax.random.normal(k1, (10, 5), jnp.float32)
    b1 = jnp.zeros((10,), jnp.float32)
    w2 = 0.01 * jax.random.normal(k2, (3, 10), jnp.float32)
    b2 = jnp.zeros((3,), jnp.float32)
    return gamma, beta, w1, b1, w2, b2


def _reference_forward(x, gamma, beta, w1, b1, w2, b2, seed):
    """Pure-JAX reference: un-folded BN/fc1/dropout/fc2 with the same hash mask."""
    n = x.shape[0]
    mean = jnp.mean(x, axis=0)
    var = jnp.mean(jnp.square(x - mean), axis=0)
    inv = gamma * jax.lax.rsqrt(var + BN_EPS)
    x_bn = (x - mean) * inv + beta                                  # (N, 5)
    h = x_bn @ w1.T + b1                                            # (N, 10)
    keep = _dropout_keep_mask((10, n), jnp.uint32(0), jnp.uint32(seed)).T  # (N, 10)
    h = jnp.where(keep, h / (1.0 - P_DROP), 0.0)
    return h @ w2.T + b2                                            # (N, 3)


if __name__ == "__main__":
    key = jax.random.PRNGKey(0)
    kx, kp = jax.random.split(key)
    x = jax.random.normal(kx, (8, 5), jnp.float32)                  # batch=8, features=5
    gamma, beta, w1, b1, w2, b2 = init_params(kp)

    out = net_forward(x, gamma, beta, w1, b1, w2, b2, seed=1234)
    out = jax.block_until_ready(out)
    assert out.shape == (8, 3) and out.dtype == jnp.float32

    ref = _reference_forward(x, gamma, beta, w1, b1, w2, b2, seed=1234)
    assert jnp.allclose(out, ref, rtol=1e-4, atol=1e-6), (out, ref)

    print("KERNEL_OK")
</pallas_src>

<mosaic_0001>
module attributes {stable_mosaic.version = 11 : i64} {
  func.func @net_kernel(%arg0: i32, %arg1: memref<1xi32, #tpu.memory_space<smem>>, %arg2: memref<5x128xf32, #tpu.memory_space<vmem>>, %arg3: memref<10x5xf32, #tpu.memory_space<vmem>>, %arg4: memref<10x1xf32, #tpu.memory_space<vmem>>, %arg5: memref<3x10xf32, #tpu.memory_space<vmem>>, %arg6: memref<3x1xf32, #tpu.memory_space<vmem>>, %arg7: memref<3x128xf32, #tpu.memory_space<vmem>>) attributes {dimension_semantics = [#tpu.dimension_semantics<parallel>], iteration_bounds = array<i64: 1>, scalar_prefetch = 1 : i64, scratch_operands = 0 : i64, tpu.core_type = #tpu.core_type<tc>, window_params = [{transform_indices = @transform_0, window_bounds = array<i64: 5, 128>}, {pipeline_mode = #tpu.pipeline_mode<synchronous>, transform_indices = @transform_1, window_bounds = array<i64: 10, 5>}, {pipeline_mode = #tpu.pipeline_mode<synchronous>, transform_indices = @transform_2, window_bounds = array<i64: 10, 1>}, {pipeline_mode = #tpu.pipeline_mode<synchronous>, transform_indices = @transform_3, window_bounds = array<i64: 3, 10>}, {pipeline_mode = #tpu.pipeline_mode<synchronous>, transform_indices = @transform_4, window_bounds = array<i64: 3, 1>}, {transform_indices = @transform_5, window_bounds = array<i64: 3, 128>}]} {
    %c0 = arith.constant 0 : index
    %c0_0 = arith.constant 0 : index
    %0 = vector.load %arg2[%c0, %c0_0] : memref<5x128xf32, #tpu.memory_space<vmem>>, vector<5x128xf32>
    %c0_1 = arith.constant 0 : index
    %c0_2 = arith.constant 0 : index
    %1 = vector.load %arg3[%c0_1, %c0_2] : memref<10x5xf32, #tpu.memory_space<vmem>>, vector<10x5xf32>
    %c0_3 = arith.constant 0 : index
    %c0_4 = arith.constant 0 : index
    %2 = vector.load %arg4[%c0_3, %c0_4] : memref<10x1xf32, #tpu.memory_space<vmem>>, vector<10x1xf32>
    %3 = vector.extract_strided_slice %1 {offsets = [0, 0], sizes = [10, 1], strides = [1, 1]} : vector<10x5xf32> to vector<10x1xf32>
    %4 = vector.extract_strided_slice %0 {offsets = [0, 0], sizes = [1, 128], strides = [1, 1]} : vector<5x128xf32> to vector<1x128xf32>
    %5 = vector.broadcast %3 : vector<10x1xf32> to vector<10x128xf32>
    %6 = vector.broadcast %4 : vector<1x128xf32> to vector<10x128xf32>
    %7 = arith.mulf %5, %6 : vector<10x128xf32>
    %8 = vector.broadcast %2 : vector<10x1xf32> to vector<10x128xf32>
    %9 = arith.addf %8, %7 : vector<10x128xf32>
    %10 = vector.extract_strided_slice %1 {offsets = [0, 1], sizes = [10, 1], strides = [1, 1]} : vector<10x5xf32> to vector<10x1xf32>
    %11 = vector.extract_strided_slice %0 {offsets = [1, 0], sizes = [1, 128], strides = [1, 1]} : vector<5x128xf32> to vector<1x128xf32>
    %12 = vector.broadcast %10 : vector<10x1xf32> to vector<10x128xf32>
    %13 = vector.broadcast %11 : vector<1x128xf32> to vector<10x128xf32>
    %14 = arith.mulf %12, %13 : vector<10x128xf32>
    %15 = arith.addf %9, %14 : vector<10x128xf32>
    %16 = vector.extract_strided_slice %1 {offsets = [0, 2], sizes = [10, 1], strides = [1, 1]} : vector<10x5xf32> to vector<10x1xf32>
    %17 = vector.extract_strided_slice %0 {offsets = [2, 0], sizes = [1, 128], strides = [1, 1]} : vector<5x128xf32> to vector<1x128xf32>
    %18 = vector.broadcast %16 : vector<10x1xf32> to vector<10x128xf32>
    %19 = vector.broadcast %17 : vector<1x128xf32> to vector<10x128xf32>
    %20 = arith.mulf %18, %19 : vector<10x128xf32>
    %21 = arith.addf %15, %20 : vector<10x128xf32>
    %22 = vector.extract_strided_slice %1 {offsets = [0, 3], sizes = [10, 1], strides = [1, 1]} : vector<10x5xf32> to vector<10x1xf32>
    %23 = vector.extract_strided_slice %0 {offsets = [3, 0], sizes = [1, 128], strides = [1, 1]} : vector<5x128xf32> to vector<1x128xf32>
    %24 = vector.broadcast %22 : vector<10x1xf32> to vector<10x128xf32>
    %25 = vector.broadcast %23 : vector<1x128xf32> to vector<10x128xf32>
    %26 = arith.mulf %24, %25 : vector<10x128xf32>
    %27 = arith.addf %21, %26 : vector<10x128xf32>
    %28 = vector.extract_strided_slice %1 {offsets = [0, 4], sizes = [10, 1], strides = [1, 1]} : vector<10x5xf32> to vector<10x1xf32>
    %29 = vector.extract_strided_slice %0 {offsets = [4, 0], sizes = [1, 128], strides = [1, 1]} : vector<5x128xf32> to vector<1x128xf32>
    %30 = vector.broadcast %28 : vector<10x1xf32> to vector<10x128xf32>
    %31 = vector.broadcast %29 : vector<1x128xf32> to vector<10x128xf32>
    %32 = arith.mulf %30, %31 : vector<10x128xf32>
    %33 = arith.addf %27, %32 : vector<10x128xf32>
    %c128_i32 = arith.constant 128 : i32
    %34 = arith.muli %arg0, %c128_i32 : i32
    %c0_5 = arith.constant 0 : index
    %35 = memref.load %arg1[%c0_5] : memref<1xi32, #tpu.memory_space<smem>>
    %36 = tpu.iota {dimensions = array<i32: 1>} : vector<1x128xi32>
    %37 = tpu.iota {dimensions = array<i32: 0>} : vector<10x1xi32>
    %38 = vector.broadcast %34 : i32 to vector<1x128xi32>
    %39 = arith.addi %36, %38 : vector<1x128xi32>
    %c-1640531527_i32 = arith.constant -1640531527 : i32
    %40 = vector.broadcast %c-1640531527_i32 : i32 to vector<1x128xi32>
    %41 = arith.muli %39, %40 : vector<1x128xi32>
    %c-2048144789_i32 = arith.constant -2048144789 : i32
    %42 = arith.muli %35, %c-2048144789_i32 : i32
    %43 = vector.broadcast %42 : i32 to vector<1x128xi32>
    %44 = arith.xori %41, %43 : vector<1x128xi32>
    %c16_i32 = arith.constant 16 : i32
    %45 = vector.broadcast %c16_i32 : i32 to vector<1x128xi32>
    %46 = arith.shrui %44, %45 : vector<1x128xi32>
    %47 = arith.xori %44, %46 : vector<1x128xi32>
    %c2146121005_i32 = arith.constant 2146121005 : i32
    %48 = vector.broadcast %c2146121005_i32 : i32 to vector<1x128xi32>
    %49 = arith.muli %47, %48 : vector<1x128xi32>
    %c15_i32 = arith.constant 15 : i32
    %50 = vector.broadcast %c15_i32 : i32 to vector<1x128xi32>
    %51 = arith.shrui %49, %50 : vector<1x128xi32>
    %52 = arith.xori %49, %51 : vector<1x128xi32>
    %c-2073254261_i32 = arith.constant -2073254261 : i32
    %53 = vector.broadcast %c-2073254261_i32 : i32 to vector<1x128xi32>
    %54 = arith.muli %52, %53 : vector<1x128xi32>
    %c16_i32_6 = arith.constant 16 : i32
    %55 = vector.broadcast %c16_i32_6 : i32 to vector<1x128xi32>
    %56 = arith.shrui %54, %55 : vector<1x128xi32>
    %57 = arith.xori %54, %56 : vector<1x128xi32>
    %c-1028477387_i32 = arith.constant -1028477387 : i32
    %58 = vector.broadcast %c-1028477387_i32 : i32 to vector<10x1xi32>
    %59 = arith.muli %37, %58 : vector<10x1xi32>
    %c-1640531527_i32_7 = arith.constant -1640531527 : i32
    %60 = arith.xori %35, %c-1640531527_i32_7 : i32
    %61 = vector.broadcast %60 : i32 to vector<10x1xi32>
    %62 = arith.xori %59, %61 : vector<10x1xi32>
    %c16_i32_8 = arith.constant 16 : i32
    %63 = vector.broadcast %c16_i32_8 : i32 to vector<10x1xi32>
    %64 = arith.shrui %62, %63 : vector<10x1xi32>
    %65 = arith.xori %62, %64 : vector<10x1xi32>
    %c2146121005_i32_9 = arith.constant 2146121005 : i32
    %66 = vector.broadcast %c2146121005_i32_9 : i32 to vector<10x1xi32>
    %67 = arith.muli %65, %66 : vector<10x1xi32>
    %c15_i32_10 = arith.constant 15 : i32
    %68 = vector.broadcast %c15_i32_10 : i32 to vector<10x1xi32>
    %69 = arith.shrui %67, %68 : vector<10x1xi32>
    %70 = arith.xori %67, %69 : vector<10x1xi32>
    %c-2073254261_i32_11 = arith.constant -2073254261 : i32
    %71 = vector.broadcast %c-2073254261_i32_11 : i32 to vector<10x1xi32>
    %72 = arith.muli %70, %71 : vector<10x1xi32>
    %c16_i32_12 = arith.constant 16 : i32
    %73 = vector.broadcast %c16_i32_12 : i32 to vector<10x1xi32>
    %74 = arith.shrui %72, %73 : vector<10x1xi32>
    %75 = arith.xori %72, %74 : vector<10x1xi32>
    %76 = vector.broadcast %57 : vector<1x128xi32> to vector<10x128xi32>
    %77 = vector.broadcast %75 : vector<10x1xi32> to vector<10x128xi32>
    %78 = arith.xori %76, %77 : vector<10x128xi32>
    %c-1640531527_i32_13 = arith.constant -1640531527 : i32
    %79 = vector.broadcast %c-1640531527_i32_13 : i32 to vector<10x128xi32>
    %80 = arith.muli %78, %79 : vector<10x128xi32>
    %c15_i32_14 = arith.constant 15 : i32
    %81 = vector.broadcast %c15_i32_14 : i32 to vector<10x128xi32>
    %82 = arith.shrui %80, %81 : vector<10x128xi32>
    %83 = arith.xori %80, %82 : vector<10x128xi32>
    %c-429496730_i32 = arith.constant -429496730 : i32
    %84 = vector.broadcast %c-429496730_i32 : i32 to vector<10x128xi32>
    %85 = arith.cmpi ult, %83, %84 : vector<10x128xi32>
    %cst = arith.constant 0.000000e+00 : f32
    %86 = vector.broadcast %cst : f32 to vector<10x128xf32>
    %87 = arith.select %85, %33, %86 : vector<10x128xi1>, vector<10x128xf32>
    %c0_15 = arith.constant 0 : index
    %c0_16 = arith.constant 0 : index
    %88 = vector.load %arg5[%c0_15, %c0_16] : memref<3x10xf32, #tpu.memory_space<vmem>>, vector<3x10xf32>
    %c0_17 = arith.constant 0 : index
    %c0_18 = arith.constant 0 : index
    %89 = vector.load %arg6[%c0_17, %c0_18] : memref<3x1xf32, #tpu.memory_space<vmem>>, vector<3x1xf32>
    %90 = vector.extract_strided_slice %88 {offsets = [0, 0], sizes = [3, 1], strides = [1, 1]} : vector<3x10xf32> to vector<3x1xf32>
    %91 = vector.extract_strided_slice %87 {offsets = [0, 0], sizes = [1, 128], strides = [1, 1]} : vector<10x128xf32> to vector<1x128xf32>
    %92 = vector.broadcast %90 : vector<3x1xf32> to vector<3x128xf32>
    %93 = vector.broadcast %91 : vector<1x128xf32> to vector<3x128xf32>
    %94 = arith.mulf %92, %93 : vector<3x128xf32>
    %95 = vector.broadcast %89 : vector<3x1xf32> to vector<3x128xf32>
    %96 = arith.addf %95, %94 : vector<3x128xf32>
    %97 = vector.extract_strided_slice %88 {offsets = [0, 1], sizes = [3, 1], strides = [1, 1]} : vector<3x10xf32> to vector<3x1xf32>
    %98 = vector.extract_strided_slice %87 {offsets = [1, 0], sizes = [1, 128], strides = [1, 1]} : vector<10x128xf32> to vector<1x128xf32>
    %99 = vector.broadcast %97 : vector<3x1xf32> to vector<3x128xf32>
    %100 = vector.broadcast %98 : vector<1x128xf32> to vector<3x128xf32>
    %101 = arith.mulf %99, %100 : vector<3x128xf32>
    %102 = arith.addf %96, %101 : vector<3x128xf32>
    %103 = vector.extract_strided_slice %88 {offsets = [0, 2], sizes = [3, 1], strides = [1, 1]} : vector<3x10xf32> to vector<3x1xf32>
    %104 = vector.extract_strided_slice %87 {offsets = [2, 0], sizes = [1, 128], strides = [1, 1]} : vector<10x128xf32> to vector<1x128xf32>
    %105 = vector.broadcast %103 : vector<3x1xf32> to vector<3x128xf32>
    %106 = vector.broadcast %104 : vector<1x128xf32> to vector<3x128xf32>
    %107 = arith.mulf %105, %106 : vector<3x128xf32>
    %108 = arith.addf %102, %107 : vector<3x128xf32>
    %109 = vector.extract_strided_slice %88 {offsets = [0, 3], sizes = [3, 1], strides = [1, 1]} : vector<3x10xf32> to vector<3x1xf32>
    %110 = vector.extract_strided_slice %87 {offsets = [3, 0], sizes = [1, 128], strides = [1, 1]} : vector<10x128xf32> to vector<1x128xf32>
    %111 = vector.broadcast %109 : vector<3x1xf32> to vector<3x128xf32>
    %112 = vector.broadcast %110 : vector<1x128xf32> to vector<3x128xf32>
    %113 = arith.mulf %111, %112 : vector<3x128xf32>
    %114 = arith.addf %108, %113 : vector<3x128xf32>
    %115 = vector.extract_strided_slice %88 {offsets = [0, 4], sizes = [3, 1], strides = [1, 1]} : vector<3x10xf32> to vector<3x1xf32>
    %116 = vector.extract_strided_slice %87 {offsets = [4, 0], sizes = [1, 128], strides = [1, 1]} : vector<10x128xf32> to vector<1x128xf32>
    %117 = vector.broadcast %115 : vector<3x1xf32> to vector<3x128xf32>
    %118 = vector.broadcast %116 : vector<1x128xf32> to vector<3x128xf32>
    %119 = arith.mulf %117, %118 : vector<3x128xf32>
    %120 = arith.addf %114, %119 : vector<3x128xf32>
    %121 = vector.extract_strided_slice %88 {offsets = [0, 5], sizes = [3, 1], strides = [1, 1]} : vector<3x10xf32> to vector<3x1xf32>
    %122 = vector.extract_strided_slice %87 {offsets = [5, 0], sizes = [1, 128], strides = [1, 1]} : vector<10x128xf32> to vector<1x128xf32>
    %123 = vector.broadcast %121 : vector<3x1xf32> to vector<3x128xf32>
    %124 = vector.broadcast %122 : vector<1x128xf32> to vector<3x128xf32>
    %125 = arith.mulf %123, %124 : vector<3x128xf32>
    %126 = arith.addf %120, %125 : vector<3x128xf32>
    %127 = vector.extract_strided_slice %88 {offsets = [0, 6], sizes = [3, 1], strides = [1, 1]} : vector<3x10xf32> to vector<3x1xf32>
    %128 = vector.extract_strided_slice %87 {offsets = [6, 0], sizes = [1, 128], strides = [1, 1]} : vector<10x128xf32> to vector<1x128xf32>
    %129 = vector.broadcast %127 : vector<3x1xf32> to vector<3x128xf32>
    %130 = vector.broadcast %128 : vector<1x128xf32> to vector<3x128xf32>
    %131 = arith.mulf %129, %130 : vector<3x128xf32>
    %132 = arith.addf %126, %131 : vector<3x128xf32>
    %133 = vector.extract_strided_slice %88 {offsets = [0, 7], sizes = [3, 1], strides = [1, 1]} : vector<3x10xf32> to vector<3x1xf32>
    %134 = vector.extract_strided_slice %87 {offsets = [7, 0], sizes = [1, 128], strides = [1, 1]} : vector<10x128xf32> to vector<1x128xf32>
    %135 = vector.broadcast %133 : vector<3x1xf32> to vector<3x128xf32>
    %136 = vector.broadcast %134 : vector<1x128xf32> to vector<3x128xf32>
    %137 = arith.mulf %135, %136 : vector<3x128xf32>
    %138 = arith.addf %132, %137 : vector<3x128xf32>
    %139 = vector.extract_strided_slice %88 {offsets = [0, 8], sizes = [3, 1], strides = [1, 1]} : vector<3x10xf32> to vector<3x1xf32>
    %140 = vector.extract_strided_slice %87 {offsets = [8, 0], sizes = [1, 128], strides = [1, 1]} : vector<10x128xf32> to vector<1x128xf32>
    %141 = vector.broadcast %139 : vector<3x1xf32> to vector<3x128xf32>
    %142 = vector.broadcast %140 : vector<1x128xf32> to vector<3x128xf32>
    %143 = arith.mulf %141, %142 : vector<3x128xf32>
    %144 = arith.addf %138, %143 : vector<3x128xf32>
    %145 = vector.extract_strided_slice %88 {offsets = [0, 9], sizes = [3, 1], strides = [1, 1]} : vector<3x10xf32> to vector<3x1xf32>
    %146 = vector.extract_strided_slice %87 {offsets = [9, 0], sizes = [1, 128], strides = [1, 1]} : vector<10x128xf32> to vector<1x128xf32>
    %147 = vector.broadcast %145 : vector<3x1xf32> to vector<3x128xf32>
    %148 = vector.broadcast %146 : vector<1x128xf32> to vector<3x128xf32>
    %149 = arith.mulf %147, %148 : vector<3x128xf32>
    %150 = arith.addf %144, %149 : vector<3x128xf32>
    %c0_19 = arith.constant 0 : index
    %c0_20 = arith.constant 0 : index
    %151 = vector.load %arg7[%c0_19, %c0_20] : memref<3x128xf32, #tpu.memory_space<vmem>>, vector<3x128xf32>
    tpu.vector_store %arg7[%c0_19, %c0_20], %150 {strides = array<i32>} : memref<3x128xf32, #tpu.memory_space<vmem>>, vector<3x128xf32>,
    return
  }
  func.func @transform_0(%arg0: i32, %arg1: memref<1xi32, #tpu.memory_space<smem>>) -> (i32, i32) {
    %c0_i32 = arith.constant 0 : i32
    %c0_i32_0 = arith.constant 0 : i32
    return %c0_i32, %arg0 : i32, i32
  }
  func.func @transform_1(%arg0: i32, %arg1: memref<1xi32, #tpu.memory_space<smem>>) -> (i32, i32) {
    %c0_i32 = arith.constant 0 : i32
    %c0_i32_0 = arith.constant 0 : i32
    %c0_i32_1 = arith.constant 0 : i32
    return %c0_i32, %c0_i32_0 : i32, i32
  }
  func.func @transform_2(%arg0: i32, %arg1: memref<1xi32, #tpu.memory_space<smem>>) -> (i32, i32) {
    %c0_i32 = arith.constant 0 : i32
    %c0_i32_0 = arith.constant 0 : i32
    %c0_i32_1 = arith.constant 0 : i32
    return %c0_i32, %c0_i32_0 : i32, i32
  }
  func.func @transform_3(%arg0: i32, %arg1: memref<1xi32, #tpu.memory_space<smem>>) -> (i32, i32) {
    %c0_i32 = arith.constant 0 : i32
    %c0_i32_0 = arith.constant 0 : i32
    %c0_i32_1 = arith.constant 0 : i32
    return %c0_i32, %c0_i32_0 : i32, i32
  }
  func.func @transform_4(%arg0: i32, %arg1: memref<1xi32, #tpu.memory_space<smem>>) -> (i32, i32) {
    %c0_i32 = arith.constant 0 : i32
    %c0_i32_0 = arith.constant 0 : i32
    %c0_i32_1 = arith.constant 0 : i32
    return %c0_i32, %c0_i32_0 : i32, i32
  }
  func.func @transform_5(%arg0: i32, %arg1: memref<1xi32, #tpu.memory_space<smem>>) -> (i32, i32) {
    %c0_i32 = arith.constant 0 : i32
    %c0_i32_0 = arith.constant 0 : i32
    return %c0_i32, %arg0 : i32, i32
  }
}

</mosaic_0001>

<bundles_post_ra>
// kernel: tpu_custom_call.1
= control target key start
LH: loop header
LB: loop body
LE: loop exit
PB: predicated region body
PF: predicated region fallthrough
CT: control target
= control target key end

     0   :  { %v351_v1 = vmov 3   ;;  %v352_v2 = vmov 1   ;;  %s458_s0 = inlined_call_operand.<no memory space> [shape: s32[1], index: 0, kind: input, shape index: {}]   ;;  %s459_s1 = inlined_call_operand.vmem [shape: f32[5,128], index: 1, kind: input, shape index: {}]   ;;  %s460_s2 = inlined_call_operand.vmem [shape: f32[10,5], index: 2, kind: input, shape index: {}]   ;;  %s461_s3 = inlined_call_operand.vmem [shape: f32[10,1], index: 3, kind: input, shape index: {}]   ;;  %s462_s4 = inlined_call_operand.vmem [shape: f32[3,10], index: 4, kind: input, shape index: {}]   ;;  %s463_s5 = inlined_call_operand.vmem [shape: f32[3,1], index: 5, kind: input, shape index: {}]   ;;  %s464_s6 = inlined_call_operand.hbm [shape: f32[3,128], index: 6, kind: output, shape index: {}]  }
   0x1   :  { %v24_v0 = vld [vmem:[%s460_s2] sm:$0xff]  ;;  %311 = vset.pattern.permute.xlu0 %v351_v1  ;;  %309 = vset.pattern.permute.xlu1 %v352_v2 }
   0x2   :  { %89 = vperm.xlu0 %311, %v24_v0   ;;  %57 = vperm.xlu1 %309, %v24_v0  }
   0x3   :  { %12 = vsyncpa [#allocation5], 0  ;;  %v353_v3 = vmov 0   ;;  %v354_v4 = vmov 2   ;;  %v26_v5 = vld [vmem:[%s461_s3] sm:$0xff]  ;;  %v355_v6 = vmov 4   ;;  %v38_v16 = vlaneseq }
   0x4   :  { %v25_v7 = vld [vmem:[%s460_s2 + $0x8] sm:$0x3]  ;;  %v175_v8 = vld [vmem:[%s462_s4] sm:$0x7]  ;;  %v356_v11 = vmov 5   ;;  %v357_v12 = vmov 8  }
   0x5   :  { %v27_v9 = vld [vmem:[%s461_s3 + $0x8] sm:$0x3]  ;;  %v176_v10 = vld [vmem:[%s463_s5] sm:$0x7]  ;;  %v358_v13 = vmov 9   ;;  %v359_v14 = vmov 6  }
   0x6   :  { %312 = vset.pattern.permute.xlu0 %v353_v3  ;;  %310 = vset.pattern.permute.xlu1 %v354_v4  ;;  %v360_v15 = vmov 7   ;;  %v415_v17 = vshrl.u32 %v38_v16, 7  ;;  %v123_v18 = vand.u32 127, %v38_v16  ;;  %s130_s4 = smul.u32 2246822507, %s458_s0 }
   0x7   :  { %30 = vperm.xlu0 %312, %v24_v0   ;;  %73 = vperm.xlu1 %310, %v24_v0   ;;  %s143_s10 = sxor.u32 2654435769, %s458_s0  ;;  %v23_v43 = vld [vmem:[%s459_s1] sm:$0x1f]  ;;  %s361_s1 = smov [#allocation4]  }
   0x8   :  { %v129_v19 = vmul.u32 2654435769, %v123_v18  ;;  %v141_v20 = vmul.u32 3266489909, %v415_v17  ;;  %v131_v21 = vstv %s130_s4  ;;  %v144_v22 = vstv %s143_s10  ;;  %s290_s12 = sshll.u32 %s361_s1, 4  ;;  %s291_s12 = int_to_ptr.vmem [resolvable:$true] %s290_s12 }
   0x9   :  { %v126_v33 = vadd.s32 8, %v415_v17  ;;  %v426_v37 = vsub.s32 0, %v415_v17  ;;  %v433_v48 = vsub.s32 1, %v415_v17  ;;  %v82_v56 = vsub.s32 2, %v415_v17  ;;  %s327_s13 = scalar_lea.vmem %s291_s12, 64  ;;  %p332_p1 = scmp.lt.s32.totalorder %s291_s12, %s291_s12 }
   0xa   :  { %v132_v23 = vxor.u32 %v131_v21, %v129_v19  ;;  %v145_v24 = vxor.u32 %v144_v22, %v141_v20  ;;  %v98_v57 = vsub.s32 3, %v415_v17  ;;  %p328_p0 = scmp.ne.s32.totalorder %s291_s12, %s327_s13  ;;  %p333_p2 = scmp.lt.s32.totalorder %s327_s13, %s327_s13 }
   0xb   :  { %46 = vperm.xlu0 %312, %v26_v5   ;;  %313 = vset.pattern.permute.xlu1 %v355_v6  ;;  %v142_v36 = vmul.u32 3266489909, %v126_v33  ;;  %v41_v44 = vrot.slane %v23_v43, %v426_v37  ;;  %v67_v55 = vrot.slane %v23_v43, %v433_v48 }
   0xc   :  { %105 = vperm.xlu1 %313, %v24_v0   ;;  %v133_v25 = vshrl.u32 %v132_v23, 16  ;;  %v147_v26 = vshrl.u32 %v145_v24, 16  ;;  %v83_v0 = vrot.slane %v23_v43, %v82_v56  ;;  %p334_p3 = por %p333_p2, %p332_p1 }
   0xd   :  { %v146_v40 = vxor.u32 %v144_v22, %v142_v36 }
   0xe   :  { %v134_v27 = vxor.u32 %v133_v25, %v132_v23  ;;  %v149_v28 = vxor.u32 %v147_v26, %v145_v24  ;;  %p335_p4 = pnand %p334_p3, %p328_p0 }
   0xf   :  { %35 = vperm.xlu0 %312, %v25_v7   ;;  %v148_v47 = vshrl.u32 %v146_v40, 16 }
  0x10   :  { %314 = vset.pattern.permute.xlu1 %v353_v3  ;;  %v135_v29 = vmul.u32 2146121005, %v134_v27  ;;  %v151_v30 = vmul.u32 2146121005, %v149_v28 }
  0x11   :  { %179 = vperm.xlu1 %314, %v175_v8   ;;  %v150_v54 = vxor.u32 %v148_v47, %v146_v40 }
  0x12   :  { %v136_v31 = vshrl.u32 %v135_v29, 15  ;;  %v153_v32 = vshrl.u32 %v151_v30, 15 }
  0x13   :  { %51 = vperm.xlu0 %312, %v27_v9   ;;  %v152_v62 = vmul.u32 2146121005, %v150_v54 }
  0x14   :  { %v137_v34 = vxor.u32 %v136_v31, %v135_v29  ;;  %v155_v35 = vxor.u32 %v153_v32, %v151_v30 }
  0x15   :  { %189 = vperm.xlu1 %314, %v176_v10  }
  0x16   :  { %v138_v38 = vmul.u32 2221713035, %v137_v34  ;;  %v157_v39 = vmul.u32 2221713035, %v155_v35 }
  0x17   :  { %316 = vset.pattern.permute.xlu0 %v354_v4 }
  0x18   :  { %204 = vperm.xlu0 %316, %v175_v8   ;;  %v139_v45 = vshrl.u32 %v138_v38, 16  ;;  %v159_v46 = vshrl.u32 %v157_v39, 16 }
  0x19   :  { %315 = vset.pattern.permute.xlu1 %v352_v2 }
  0x1a   :  { %194 = vperm.xlu1 %315, %v175_v8   ;;  %v140_v52 = vxor.u32 %v139_v45, %v138_v38  ;;  %v161_v53 = vxor.u32 %v159_v46, %v157_v39 }
  0x1c   :  { %319 = vset.pattern.permute.xlu0 %v351_v1  ;;  %v163_v60 = vxor.u32 %v161_v53, %v140_v52 }
  0x1d   :  { %93 = vperm.xlu0 %319, %v25_v7  }
  0x1e   :  { %61 = vperm.xlu1 %315, %v25_v7   ;;  %v165_v3 = vmul.u32 2654435769, %v163_v60  ;;  %v249_v60 = vsub.s32 6, %v415_v17 }
  0x20   :  { %v167_v10 = vshrl.u32 %v165_v3, 15 }
  0x21   :  { %321 = vset.pattern.permute.xlu0 %v356_v11 }
  0x22   :  { %234 = vperm.xlu0 %321, %v175_v8   ;;  %317 = vset.pattern.permute.xlu1 %v354_v4  ;;  %v154_v4 = vshrl.u32 %v152_v62, 15 }
  0x23   :  { %77 = vperm.xlu1 %317, %v25_v7  }
  0x24   :  { %v156_v11 = vxor.u32 %v154_v4, %v152_v62 }
  0x26   :  { %324 = vset.pattern.permute.xlu0 %v357_v12  ;;  %v158_v16 = vmul.u32 2221713035, %v156_v11 }
  0x27   :  { %318 = vset.pattern.permute.xlu1 %v351_v1  ;;  %264 = vperm.xlu0 %324, %v175_v8   ;;  %v99_v1 = vrot.slane %v23_v43, %v98_v57 }
  0x28   :  { %214 = vperm.xlu1 %318, %v175_v8   ;;  %v160_v21 = vshrl.u32 %v158_v16, 16 }
  0x2a   :  { %v162_v25 = vxor.u32 %v160_v21, %v158_v16 }
  0x2b   :  { %326 = vset.pattern.permute.xlu0 %v358_v13 }
  0x2c   :  { %320 = vset.pattern.permute.xlu1 %v355_v6  ;;  %v114_v6 = vsub.s32 4, %v415_v17  ;;  %v164_v30 = vxor.u32 %v162_v25, %v140_v52 }
  0x2d   :  { %224 = vperm.xlu1 %320, %v175_v8  }
  0x2e   :  { %v115_v12 = vrot.slane %v23_v43, %v114_v6  ;;  %v166_v36 = vmul.u32 2654435769, %v164_v30 }
  0x30   :  { %v168_v45 = vshrl.u32 %v166_v36, 15 }
  0x31   :  { %109 = vperm.xlu1 %320, %v25_v7  }
  0x35   :  { %322 = vset.pattern.permute.xlu1 %v359_v14 }
  0x36   :  { %244 = vperm.xlu1 %322, %v175_v8  }
  0x3a   :  { %323 = vset.pattern.permute.xlu1 %v360_v15  ;;  %v169_v15 = vxor.u32 %v167_v10, %v165_v3 }
  0x3b   :  { %254 = vperm.xlu1 %323, %v175_v8  }
  0x3c   :  { %vm171_vm0 = vcmp.lt.u32.totalorder %v169_v15, 3865470566 }
  0x3f   :  { %325 = vset.pattern.permute.xlu1 %v358_v13 }
  0x40   :  { %274 = vperm.xlu1 %325, %v175_v8  }
  0x81   :  { %v58_v41 = vpop.permute.xlu1 %57  ;;  %v90_v42 = vpop.permute.xlu0 %89 }
  0x82   :  { %v68_v63 = vmul.f32 %v67_v55, %v58_v41  ;;  %v100_v8 = vmul.f32 %v99_v1, %v90_v42 }
  0x86   :  { %v31_v49 = vpop.permute.xlu0 %30  ;;  %v74_v50 = vpop.permute.xlu1 %73 }
  0x87   :  { %v42_v51 = vmul.f32 %v41_v44, %v31_v49  ;;  %v84_v5 = vmul.f32 %v83_v0, %v74_v50 }
  0x8a   :  { %v47_v58 = vpop.permute.xlu0 %46 }
  0x8b   :  { %v54_v59 = vadd.f32 %v47_v58, %v42_v51  ;;  %v106_v61 = vpop.permute.xlu1 %105  ;;  %v170_v58 = vxor.u32 %v168_v45, %v166_v36 }
  0x8c   :  { %v116_v18 = vmul.f32 %v115_v12, %v106_v61 }
  0x8d   :  { %v70_v2 = vadd.f32 %v68_v63, %v54_v59  ;;  %vm172_vm1 = vcmp.lt.u32.totalorder %v170_v58, 3865470566 }
  0x8e   :  { %v36_v22 = vpop.permute.xlu0 %35 }
  0x8f   :  { %v86_v9 = vadd.f32 %v84_v5, %v70_v2  ;;  %v43_v29 = vmul.f32 %v41_v44, %v36_v22 }
  0x90   :  { %v180_v7 = vpop.permute.xlu1 %179 }
  0x91   :  { %v102_v14 = vadd.f32 %v100_v8, %v86_v9 }
  0x92   :  { %v52_v27 = vpop.permute.xlu0 %51 }
  0x93   :  { %v118_v20 = vadd.f32 %v116_v18, %v102_v14  ;;  %v55_v32 = vadd.f32 %v52_v27, %v43_v29 }
  0x94   :  { %v190_v13 = vpop.permute.xlu1 %189 }
  0x95   :  { %v173_v24 = vsel %vm171_vm0, %v118_v20, 0.0 }
  0x96   :  { %v185_v26 = vrot.slane %v173_v24, %v426_v37  ;;  %v200_v33 = vrot.slane %v173_v24, %v433_v48  ;;  %v210_v42 = vrot.slane %v173_v24, %v82_v56  ;;  %v220_v51 = vrot.slane %v173_v24, %v98_v57 }
  0x97   :  { %v205_v38 = vpop.permute.xlu0 %204  ;;  %v230_v54 = vrot.slane %v173_v24, %v114_v6  ;;  %v250_v5 = vrot.slane %v173_v24, %v249_v60  ;;  %v259_v6 = vsub.s32 7, %v415_v17 }
  0x98   :  { %v186_v31 = vmul.f32 %v185_v26, %v180_v7  ;;  %v211_v52 = vmul.f32 %v210_v42, %v205_v38 }
  0x99   :  { %v195_v19 = vpop.permute.xlu1 %194 }
  0x9a   :  { %v192_v39 = vadd.f32 %v190_v13, %v186_v31  ;;  %v201_v40 = vmul.f32 %v200_v33, %v195_v19  ;;  %v260_v13 = vrot.slane %v173_v24, %v259_v6 }
  0x9c   :  { %v94_v46 = vpop.permute.xlu0 %93  ;;  %v202_v49 = vadd.f32 %v201_v40, %v192_v39 }
  0x9d   :  { %v62_v23 = vpop.permute.xlu1 %61  ;;  %v101_v50 = vmul.f32 %v99_v1, %v94_v46 }
  0x9e   :  { %v69_v34 = vmul.f32 %v67_v55, %v62_v23  ;;  %v239_v55 = vsub.s32 5, %v415_v17  ;;  %v212_v61 = vadd.f32 %v211_v52, %v202_v49 }
  0xa0   :  { %v71_v43 = vadd.f32 %v69_v34, %v55_v32  ;;  %v240_v1 = vrot.slane %v173_v24, %v239_v55 }
  0xa1   :  { %v235_v3 = vpop.permute.xlu0 %234 }
  0xa2   :  { %v78_v28 = vpop.permute.xlu1 %77  ;;  %v241_v8 = vmul.f32 %v240_v1, %v235_v3 }
  0xa3   :  { %v85_v41 = vmul.f32 %v83_v0, %v78_v28 }
  0xa5   :  { %v87_v44 = vadd.f32 %v85_v41, %v71_v43 }
  0xa6   :  { %v265_v14 = vpop.permute.xlu0 %264 }
  0xa7   :  { %v215_v35 = vpop.permute.xlu1 %214  ;;  %v103_v56 = vadd.f32 %v101_v50, %v87_v44 }
  0xa8   :  { %v221_v53 = vmul.f32 %v220_v51, %v215_v35 }
  0xaa   :  { %v222_v0 = vadd.f32 %v221_v53, %v212_v61 }
  0xac   :  { %v225_v47 = vpop.permute.xlu1 %224 }
  0xad   :  { %v231_v62 = vmul.f32 %v230_v54, %v225_v47 }
  0xaf   :  { %v232_v4 = vadd.f32 %v231_v62, %v222_v0 }
  0xb0   :  { %v110_v59 = vpop.permute.xlu1 %109 }
  0xb1   :  { %v117_v63 = vmul.f32 %v115_v12, %v110_v59  ;;  %v242_v10 = vadd.f32 %v241_v8, %v232_v4 }
  0xb3   :  { %v119_v2 = vadd.f32 %v117_v63, %v103_v56 }
  0xb5   :  { %v245_v57 = vpop.permute.xlu1 %244  ;;  %v174_v7 = vsel %vm172_vm1, %v119_v2, 0.0 }
  0xb6   :  { %v251_v9 = vmul.f32 %v250_v5, %v245_v57  ;;  %v270_v11 = vrot.slane %v174_v7, %v426_v37  ;;  %v280_v20 = vrot.slane %v174_v7, %v433_v48 }
  0xb8   :  { %v252_v12 = vadd.f32 %v251_v9, %v242_v10  ;;  %v271_v18 = vmul.f32 %v270_v11, %v265_v14 }
  0xba   :  { %v255_v15 = vpop.permute.xlu1 %254 }
  0xbb   :  { %v261_v16 = vmul.f32 %v260_v13, %v255_v15 }
  0xbd   :  { %v262_v19 = vadd.f32 %v261_v16, %v252_v12 }
  0xbf   :  { %v275_v21 = vpop.permute.xlu1 %274  ;;  %v272_v22 = vadd.f32 %v271_v18, %v262_v19 }
  0xc0   :  { %v281_v17 = vmul.f32 %v280_v20, %v275_v21 }
  0xc2   :  { %v282_v23 = vadd.f32 %v281_v17, %v272_v22 }
  0xc4   :  { %283 = vst [vmem:[#allocation4] sm:$0x7] %v282_v23 }
  0xc5   :  { %338 = shalt.err (!%p335_p4)
}
  0xc6   :  { %s339_s16 = scalar_lea.hbm %s464_s6, 64 }
  0xc7   :  { %p340_p5 = scmp.ne.s32.totalorder %s464_s6, %s339_s16  ;;  %p343_p6 = scmp.lt.u32.totalorder %s339_s16, %s464_s6 }
  0xc9   :  { %p345_p7 = pnand %p343_p6, %p340_p5 }
  0xcb   :  { %348 = shalt.err (!%p345_p7)
}
  0xcc   :  { %293 = dma.vmem_to_hbm [thread:$0]  %s291_s12, 64, %s464_s6, [#allocation5]  }
  0xcd   :  { %349 = dma.done.wait [#allocation5], 64  }
  0xce   :  { %350 = vsyncadd [#allocation5], 4294967232 }
  0xcf   :  { %297 = vsyncpa [#allocation5], 1 }

</bundles_post_ra>
